<compile_context>
chip_gen: v7x
topology: tpu7x:2x2x1
jax: 0.10.0
libtpu: 0.0.40
codegen_flags: <defaults>
</compile_context>

<pallas_src>
import math

import jax
import jax.numpy as jnp
from jax import lax
from jax.experimental import pallas as pl
from jax.experimental.pallas import tpu as pltpu


# -----------------------------------------------------------------------------
# Parameter re-layout (done ONCE at init time, not per forward call).
# -----------------------------------------------------------------------------
def prepare_gsu_params(weight_ih, weight_hh, bias_ih, *, shared_weights=False,
                       param_dtype=jnp.float32):
    """Re-lay-out PyTorch-style parameters for the fused-gate kernels.

    weight_ih: (2H, I) or (H, I) if shared_weights
    weight_hh: (2H, H) or (H, H) if shared_weights
    bias_ih:   (2H,)
    Returns (w_i, w_h, bias) with
      w_i  : (I, 2H)  columns packed [forget | cell]  (== weight_ih.T), param_dtype
      w_h  : (H, 2H)                                  (== weight_hh.T), param_dtype
      bias : (1, 2H)  float32 (added after f32 accumulation)
    """
    if shared_weights:
        weight_ih = jnp.tile(weight_ih, (2, 1))
        weight_hh = jnp.tile(weight_hh, (2, 1))
    w_i = weight_ih.T.astype(param_dtype)
    w_h = weight_hh.T.astype(param_dtype)
    bias = bias_ih.reshape(1, -1).astype(jnp.float32)
    return w_i, w_h, bias


def _vmem_limit_bytes(tb, B, I, H, w_itemsize):
    f32 = 4
    resident = (I + H) * 2 * H * w_itemsize + 2 * H * f32 + 4 * B * H * f32
    streamed = tb * B * (I + 4 * H) * f32
    est = 2 * resident + 2 * streamed + (8 << 20)
    return int(min(max(est, 32 << 20), 128 << 20))


# -----------------------------------------------------------------------------
# Kernels
# -----------------------------------------------------------------------------
def _gate_proj_kernel(x_ref, wi_ref, b_ref, g_ref):
    """Hoisted, time-independent input projection: g = x @ w_i + bias.

    x_ref: (Rb, I) rows of the flattened (T*B, I) input; one big MXU matmul,
    f32 accumulation; bias folded here so the serial loop has zero broadcasts.
    """
    w = wi_ref[...]
    g_ref[...] = (
        jnp.dot(x_ref[...].astype(w.dtype), w, preferred_element_type=jnp.float32)
        + b_ref[...]
    )


def _gsu_seq_kernel(g_ref, h0_ref, c0_ref, wh_ref, hy_ref, cy_ref, h_scr, c_scr):
    """Recurrent part: Tb timesteps per grid step, time axis sequential.

    g_ref : (Tb, B, 2H) precomputed gate slab for this time chunk (pipelined).
    wh_ref: (H, 2H)     VMEM-resident recurrent weights (block index constant).
    h_scr / c_scr carry the state across grid iterations (h in weight dtype --
    spike values are exactly 0/1 so bf16 is lossless; c stays f32).
    """
    H = c0_ref.shape[-1]
    tb = g_ref.shape[0]
    wh = wh_ref[...]

    @pl.when(pl.program_id(0) == 0)
    def _():
        h_scr[...] = h0_ref[...].astype(h_scr.dtype)
        c_scr[...] = c0_ref[...]

    def step(i, carry):
        h, c = carry
        gates = g_ref[i] + jnp.dot(h, wh, preferred_element_type=jnp.float32)
        f = jax.nn.sigmoid(gates[:, :H])          # forget gate (EUP)
        cg = gates[:, H:]                         # raw cell gate
        cy = cg + f * (c - cg)                    # == f*cx + (1-f)*cg
        hy = (cy >= 0.0).astype(jnp.float32)      # Triangle.forward
        hy_ref[i] = hy
        cy_ref[i] = cy
        return hy.astype(h_scr.dtype), cy

    h, c = lax.fori_loop(0, tb, step, (h_scr[...], c_scr[...]), unroll=True)
    h_scr[...] = h
    c_scr[...] = c


def _gsu_cell_kernel(x_ref, hx_ref, cx_ref, wi_ref, wh_ref, b_ref, hy_ref, cy_ref):
    """Single-step GSU cell (for API parity; sequences should use gsu_cell_scan)."""
    H = cx_ref.shape[-1]
    wi = wi_ref[...]
    wh = wh_ref[...]
    gates = (
        jnp.dot(x_ref[...].astype(wi.dtype), wi, preferred_element_type=jnp.float32)
        + jnp.dot(hx_ref[...].astype(wh.dtype), wh, preferred_element_type=jnp.float32)
        + b_ref[...]
    )
    f = jax.nn.sigmoid(gates[:, :H])
    cg = gates[:, H:]
    cy = cg + f * (cx_ref[...] - cg)
    hy = (cy >= 0.0).astype(jnp.float32)
    hy_ref[...] = hy
    cy_ref[...] = cy


# -----------------------------------------------------------------------------
# Wrappers
# -----------------------------------------------------------------------------
def gsu_cell_forward(x, hx, cx, w_i, w_h, bias):
    """Single-step forward matching GSUCell.forward. Returns (hy, (hy, cy)).

    NOTE: never drive a sequence through this in a host loop -- use gsu_cell_scan.
    """
    B = x.shape[0]
    H = hx.shape[1]
    hy, cy = pl.pallas_call(
        _gsu_cell_kernel,
        out_shape=(jax.ShapeDtypeStruct((B, H), jnp.float32),
                   jax.ShapeDtypeStruct((B, H), jnp.float32)),
    )(x, hx, cx, w_i, w_h, bias)
    return hy, (hy, cy)


def gsu_cell_scan(xs, hx, cx, w_i, w_h, bias, *, block_t=8):
    """Run the GSU cell over a whole sequence.

    xs: (T, B, I), hx/cx: (B, H).  Returns (hys, cys), each (T, B, H) float32.
    """
    T, B, I = xs.shape
    H = hx.shape[1]
    assert w_i.shape == (I, 2 * H) and w_h.shape == (H, 2 * H)

    # Largest time block <= block_t that divides T.
    tb = max(1, min(block_t, T))
    while T % tb != 0:
        tb -= 1

    vmem_limit = _vmem_limit_bytes(tb, B, I, H, jnp.dtype(w_i.dtype).itemsize)

    # ---- Phase 1: hoisted input projection over all T*B rows (row-parallel). ----
    x_flat = xs.reshape(T * B, I)
    rb = tb * B
    gates = pl.pallas_call(
        _gate_proj_kernel,
        out_shape=jax.ShapeDtypeStruct((T * B, 2 * H), jnp.float32),
        grid=((T * B) // rb,),
        in_specs=[
            pl.BlockSpec((rb, I), lambda r: (r, 0)),
            pl.BlockSpec((I, 2 * H), lambda r: (0, 0)),     # resident weights
            pl.BlockSpec((1, 2 * H), lambda r: (0, 0)),     # resident bias
        ],
        out_specs=pl.BlockSpec((rb, 2 * H), lambda r: (r, 0)),
        compiler_params=pltpu.CompilerParams(
            dimension_semantics=("parallel",),
            vmem_limit_bytes=vmem_limit),
    )(x_flat, w_i, bias)
    gates = gates.reshape(T, B, 2 * H)

    # ---- Phase 2: sequential recurrence, tb timesteps per grid step. ----
    hys, cys = pl.pallas_call(
        _gsu_seq_kernel,
        out_shape=(jax.ShapeDtypeStruct((T, B, H), jnp.float32),
                   jax.ShapeDtypeStruct((T, B, H), jnp.float32)),
        grid=(T // tb,),
        in_specs=[
            pl.BlockSpec((tb, B, 2 * H), lambda t: (t, 0, 0)),   # gate slab chunk
            pl.BlockSpec((B, H), lambda t: (0, 0)),              # h0
            pl.BlockSpec((B, H), lambda t: (0, 0)),              # c0
            pl.BlockSpec((H, 2 * H), lambda t: (0, 0)),          # w_h (resident)
        ],
        out_specs=(pl.BlockSpec((tb, B, H), lambda t: (t, 0, 0)),
                   pl.BlockSpec((tb, B, H), lambda t: (t, 0, 0))),
        scratch_shapes=[pltpu.VMEM((B, H), w_h.dtype),           # carried hy (0/1)
                        pltpu.VMEM((B, H), jnp.float32)],        # carried cy (f32)
        compiler_params=pltpu.CompilerParams(
            dimension_semantics=("arbitrary",),                  # time is sequential
            vmem_limit_bytes=vmem_limit),
    )(gates, hx, cx, w_h)
    return hys, cys


# -----------------------------------------------------------------------------
# Pure-JAX references mirroring the PyTorch code, for validation.
# -----------------------------------------------------------------------------
def _ref_forward(x, hx, cx, weight_ih, weight_hh, bias_ih):
    gates = x @ weight_ih.T + bias_ih + hx @ weight_hh.T
    H = hx.shape[1]
    f = jax.nn.sigmoid(gates[:, :H])
    c = gates[:, H:]
    cy = f * cx + (1.0 - f) * c
    hy = (cy >= 0.0).astype(jnp.float32)
    return hy, cy


def _ref_scan(xs, hx, cx, weight_ih, weight_hh, bias_ih):
    def step(carry, x):
        h, c = carry
        hy, cy = _ref_forward(x, h, c, weight_ih, weight_hh, bias_ih)
        return (hy, cy), (hy, cy)

    _, (hys, cys) = lax.scan(step, (hx, cx), xs)
    return hys, cys


if __name__ == "__main__":
    # Small shapes consistent with the module's forward:
    #   input (B, input_size), state (hx, cx) each (B, hidden_size).
    B, INPUT_SIZE, HIDDEN_SIZE, T = 8, 48, 32, 16

    key = jax.random.PRNGKey(0)
    kx, kh, kc, kwi, kwh, kb, ks = jax.random.split(key, 7)

    stdv = 1.0 / math.sqrt(HIDDEN_SIZE)
    weight_ih = jax.random.uniform(kwi, (2 * HIDDEN_SIZE, INPUT_SIZE),
                                   jnp.float32, -stdv, stdv)
    weight_hh = jax.random.uniform(kwh, (2 * HIDDEN_SIZE, HIDDEN_SIZE),
                                   jnp.float32, -stdv, stdv)
    bias_ih = jax.random.uniform(kb, (2 * HIDDEN_SIZE,),
                                 jnp.float32, -stdv, stdv)

    x = jax.random.normal(kx, (B, INPUT_SIZE), jnp.float32)
    hx = jax.random.normal(kh, (B, HIDDEN_SIZE), jnp.float32)
    cx = jax.random.normal(kc, (B, HIDDEN_SIZE), jnp.float32)
    xs = jax.random.normal(ks, (T, B, INPUT_SIZE), jnp.float32)

    # ---------------- f32 parameters ----------------
    w_i, w_h, bias = prepare_gsu_params(weight_ih, weight_hh, bias_ih)

    # Single-step kernel vs pure-JAX reference.
    hy, (hy2, cy) = gsu_cell_forward(x, hx, cx, w_i, w_h, bias)
    jax.block_until_ready((hy, cy))
    hy_ref, cy_ref = _ref_forward(x, hx, cx, weight_ih, weight_hh, bias_ih)
    assert jnp.allclose(cy, cy_ref, atol=1e-5), "cy mismatch"
    assert jnp.array_equal(hy, (cy >= 0.0).astype(jnp.float32)), "hy inconsistent with cy"
    safe = jnp.abs(cy_ref) > 1e-4
    assert bool(jnp.all(jnp.where(safe, hy == hy_ref, True))), "hy mismatch"

    # Sequence kernel (hoisted projection + blocked recurrence) vs reference scan.
    hys, cys = gsu_cell_scan(xs, hx, cx, w_i, w_h, bias, block_t=8)
    jax.block_until_ready((hys, cys))
    hys_ref, cys_ref = _ref_scan(xs, hx, cx, weight_ih, weight_hh, bias_ih)
    assert jnp.allclose(cys, cys_ref, atol=1e-4, rtol=1e-4), "seq cy mismatch"
    assert jnp.array_equal(hys, (cys >= 0.0).astype(jnp.float32)), "seq hy inconsistent"
    safe = jnp.abs(cys_ref) > 1e-3
    assert bool(jnp.all(jnp.where(safe, hys == hys_ref, True))), "seq hy mismatch"

    # ---------------- bf16 parameters (f32 accumulation, f32 cell-state carry) ----
    w_i_b, w_h_b, bias_b = prepare_gsu_params(weight_ih, weight_hh, bias_ih,
                                              param_dtype=jnp.bfloat16)
    hys_b, cys_b = gsu_cell_scan(xs, hx, cx, w_i_b, w_h_b, bias_b, block_t=8)
    jax.block_until_ready((hys_b, cys_b))

    # Fair reference: same bf16-rounded operands, f32 accumulation.
    r = lambda a: a.astype(jnp.bfloat16).astype(jnp.float32)
    hys_bref, cys_bref = _ref_scan(r(xs), r(hx), cx, r(weight_ih), r(weight_hh), bias_ih)
    assert jnp.allclose(cys_b, cys_bref, atol=1e-3, rtol=1e-3), "bf16 seq cy mismatch"
    assert jnp.array_equal(hys_b, (cys_b >= 0.0).astype(jnp.float32)), "bf16 hy inconsistent"
    safe = jnp.abs(cys_bref) > 1e-2
    assert bool(jnp.all(jnp.where(safe, hys_b == hys_bref, True))), "bf16 seq hy mismatch"

    # TODO(synk): use_bn=True path (nn.BatchNorm1d on cy) not implemented; defaults to bn=False.
    # TODO(synk): Triangle.backward surrogate gradient not implemented (forward-only kernel).
    print("KERNEL_OK")
</pallas_src>

<mosaic_0001>
module attributes {stable_mosaic.version = 11 : i64} {
  func.func @_gsu_cell_kernel(%arg0: memref<8x48xf32, #tpu.memory_space<vmem>>, %arg1: memref<8x32xf32, #tpu.memory_space<vmem>>, %arg2: memref<8x32xf32, #tpu.memory_space<vmem>>, %arg3: memref<48x64xf32, #tpu.memory_space<vmem>>, %arg4: memref<32x64xf32, #tpu.memory_space<vmem>>, %arg5: memref<1x64xf32, #tpu.memory_space<vmem>>, %arg6: memref<8x32xf32, #tpu.memory_space<vmem>>, %arg7: memref<8x32xf32, #tpu.memory_space<vmem>>) attributes {dimension_semantics = [], scalar_prefetch = 0 : i64, scratch_operands = 0 : i64, tpu.core_type = #tpu.core_type<tc>} {
    %c0 = arith.constant 0 : index
    %c0_0 = arith.constant 0 : index
    %0 = vector.load %arg3[%c0, %c0_0] : memref<48x64xf32, #tpu.memory_space<vmem>>, vector<48x64xf32>
    %c0_1 = arith.constant 0 : index
    %c0_2 = arith.constant 0 : index
    %1 = vector.load %arg4[%c0_1, %c0_2] : memref<32x64xf32, #tpu.memory_space<vmem>>, vector<32x64xf32>
    %c0_3 = arith.constant 0 : index
    %c0_4 = arith.constant 0 : index
    %2 = vector.load %arg0[%c0_3, %c0_4] : memref<8x48xf32, #tpu.memory_space<vmem>>, vector<8x48xf32>
    %cst = arith.constant dense<0.000000e+00> : vector<8x64xf32>
    %3 = tpu.matmul %2, %0, %cst {dimension_numbers = #tpu.dot_dimension_numbers<[1], [0], [0], [1], [0, 0, 1, 1], [], []>} : vector<8x48xf32>, vector<48x64xf32>, vector<8x64xf32> -> vector<8x64xf32>
    %c0_5 = arith.constant 0 : index
    %c0_6 = arith.constant 0 : index
    %4 = vector.load %arg1[%c0_5, %c0_6] : memref<8x32xf32, #tpu.memory_space<vmem>>, vector<8x32xf32>
    %cst_7 = arith.constant dense<0.000000e+00> : vector<8x64xf32>
    %5 = tpu.matmul %4, %1, %cst_7 {dimension_numbers = #tpu.dot_dimension_numbers<[1], [0], [0], [1], [0, 0, 1, 1], [], []>} : vector<8x32xf32>, vector<32x64xf32>, vector<8x64xf32> -> vector<8x64xf32>
    %6 = arith.addf %3, %5 : vector<8x64xf32>
    %c0_8 = arith.constant 0 : index
    %c0_9 = arith.constant 0 : index
    %7 = vector.load %arg5[%c0_8, %c0_9] : memref<1x64xf32, #tpu.memory_space<vmem>>, vector<1x64xf32>
    %8 = vector.broadcast %7 : vector<1x64xf32> to vector<8x64xf32>
    %9 = arith.addf %6, %8 : vector<8x64xf32>
    %10 = vector.extract_strided_slice %9 {offsets = [0, 0], sizes = [8, 32], strides = [1, 1]} : vector<8x64xf32> to vector<8x32xf32>
    %11 = arith.negf %10 : vector<8x32xf32>
    %12 = math.exp %11 : vector<8x32xf32>
    %cst_10 = arith.constant 1.000000e+00 : f32
    %13 = vector.broadcast %cst_10 : f32 to vector<8x32xf32>
    %14 = arith.addf %13, %12 : vector<8x32xf32>
    %15 = arith.divf %13, %14 : vector<8x32xf32>
    %16 = vector.extract_strided_slice %9 {offsets = [0, 32], sizes = [8, 32], strides = [1, 1]} : vector<8x64xf32> to vector<8x32xf32>
    %c0_11 = arith.constant 0 : index
    %c0_12 = arith.constant 0 : index
    %17 = vector.load %arg2[%c0_11, %c0_12] : memref<8x32xf32, #tpu.memory_space<vmem>>, vector<8x32xf32>
    %18 = arith.subf %17, %16 : vector<8x32xf32>
    %19 = arith.mulf %15, %18 : vector<8x32xf32>
    %20 = arith.addf %16, %19 : vector<8x32xf32>
    %cst_13 = arith.constant 0.000000e+00 : f32
    %21 = vector.broadcast %cst_13 : f32 to vector<8x32xf32>
    %22 = arith.cmpf oge, %20, %21 : vector<8x32xf32>
    %23 = arith.extui %22 : vector<8x32xi1> to vector<8x32xi32>
    %24 = arith.sitofp %23 : vector<8x32xi32> to vector<8x32xf32>
    %c0_14 = arith.constant 0 : index
    %c0_15 = arith.constant 0 : index
    %25 = vector.load %arg6[%c0_14, %c0_15] : memref<8x32xf32, #tpu.memory_space<vmem>>, vector<8x32xf32>
    tpu.vector_store %arg6[%c0_14, %c0_15], %24 {strides = array<i32>} : memref<8x32xf32, #tpu.memory_space<vmem>>, vector<8x32xf32>,
    %c0_16 = arith.constant 0 : index
    %c0_17 = arith.constant 0 : index
    %26 = vector.load %arg7[%c0_16, %c0_17] : memref<8x32xf32, #tpu.memory_space<vmem>>, vector<8x32xf32>
    tpu.vector_store %arg7[%c0_16, %c0_17], %20 {strides = array<i32>} : memref<8x32xf32, #tpu.memory_space<vmem>>, vector<8x32xf32>,
    return
  }
}

</mosaic_0001>

<bundles_post_ra>
// kernel: tpu_custom_call.1
= control target key start
LH: loop header
LB: loop body
LE: loop exit
PB: predicated region body
PF: predicated region fallthrough
CT: control target
= control target key end

     0   :  { %13 = vsyncpa [#allocation3], 0  ;;  %s716_s0 = inlined_call_operand.hbm [shape: f32[8,48], index: 0, kind: input, shape index: {}]   ;;  %s717_s1 = inlined_call_operand.hbm [shape: f32[8,32], index: 1, kind: input, shape index: {}]   ;;  %s718_s2 = inlined_call_operand.hbm [shape: f32[8,32], index: 2, kind: input, shape index: {}]   ;;  %s719_s3 = inlined_call_operand.hbm [shape: f32[48,64], index: 3, kind: input, shape index: {}]   ;;  %s720_s4 = inlined_call_operand.hbm [shape: f32[32,64], index: 4, kind: input, shape index: {}]   ;;  %s721_s5 = inlined_call_operand.vmem [shape: f32[1,64], index: 5, kind: input, shape index: {}]   ;;  %s722_s6 = inlined_call_operand.hbm [shape: f32[8,32], index: 6, kind: output, shape index: {0}]   ;;  %s723_s7 = inlined_call_operand.hbm [shape: f32[8,32], index: 7, kind: output, shape index: {1}]  }
   0x1   :  { %14 = vsyncpa [#allocation6], 0 }
   0x2   :  { %15 = vsyncpa [#allocation9], 0 }
   0x3   :  { %16 = vsyncpa [#allocation4], 0 }
   0x4   :  { %17 = vsyncpa [#allocation13], 0  ;;  %s559_s24 = smov [#allocation5]   ;;  %s560_s26 = smov [#allocation8]  }
   0x5   :  { %s34_s25 = sshll.u32 %s559_s24, 4  ;;  %s53_s27 = sshll.u32 %s560_s26, 4  ;;  %s35_s25 = int_to_ptr.vmem [resolvable:$true] %s34_s25  ;;  %s613_s27 = int_to_ptr.vmem [resolvable:$true] %s53_s27 }
   0x6   :  { %s395_s30 = scalar_lea.hbm %s717_s1, 128 }
   0x7   :  { %p396_p0 = scmp.ne.s32.totalorder %s717_s1, %s395_s30  ;;  %p399_p1 = scmp.lt.u32.totalorder %s395_s30, %s717_s1 }
   0x9   :  { %p401_p2 = pnand %p399_p1, %p396_p0 }
   0xb   :  { %404 = shalt.err (!%p401_p2)
}
   0xc   :  { %s405_s12 = scalar_lea.vmem %s35_s25, 128  ;;  %p410_p4 = scmp.lt.s32.totalorder %s35_s25, %s35_s25 }
   0xd   :  { %p406_p3 = scmp.ne.s32.totalorder %s35_s25, %s405_s12  ;;  %p411_p5 = scmp.lt.s32.totalorder %s405_s12, %s405_s12 }
   0xf   :  { %p412_p6 = por %p411_p5, %p410_p4 }
  0x11   :  { %p413_p7 = pnand %p412_p6, %p406_p3 }
  0x13   :  { %416 = shalt.err (!%p413_p7)
}
  0x14   :  { %37 = dma.hbm_to_vmem [thread:$0]  %s717_s1, 128, %s35_s25, [#allocation6]  }
  0x15   :  { %s417_s17 = scalar_lea.hbm %s719_s3, 768 }
  0x16   :  { %p418_p8 = scmp.ne.s32.totalorder %s719_s3, %s417_s17  ;;  %p421_p9 = scmp.lt.u32.totalorder %s417_s17, %s719_s3 }
  0x18   :  { %p423_p10 = pnand %p421_p9, %p418_p8 }
  0x1a   :  { %426 = shalt.err (!%p423_p10)
}
  0x1b   :  { %s427_s22 = scalar_lea.vmem %s613_s27, 768  ;;  %p432_p12 = scmp.lt.s32.totalorder %s613_s27, %s613_s27 }
  0x1c   :  { %p428_p11 = scmp.ne.s32.totalorder %s613_s27, %s427_s22  ;;  %p433_p13 = scmp.lt.s32.totalorder %s427_s22, %s427_s22 }
  0x1e   :  { %p434_p0 = por %p433_p13, %p432_p12 }
  0x20   :  { %p435_p1 = pnand %p434_p0, %p428_p11 }
  0x22   :  { %438 = shalt.err (!%p435_p1)
}
  0x23   :  { %s561_s1 = smov 128   ;;  %s562_s23 = smov 8  }
  0x24   :  { %59 = dma.hbm_to_vmem [thread:$0]  %s719_s3, 768, %s613_s27, [#allocation9], %s561_s1, %s561_s1, %s562_s23  }
  0x25   :  { %s563_s26 = smov [#allocation2]   ;;  %s564_s29 = smov [#allocation7]  }
  0x26   :  { %s24_s28 = sshll.u32 %s563_s26, 4  ;;  %s44_s30 = sshll.u32 %s564_s29, 4  ;;  %s25_s28 = int_to_ptr.vmem [resolvable:$true] %s24_s28  ;;  %s45_s30 = int_to_ptr.vmem [resolvable:$true] %s44_s30 }
  0x27   :  { %s439_s10 = scalar_lea.hbm %s716_s0, 128 }
  0x28   :  { %p440_p2 = scmp.ne.s32.totalorder %s716_s0, %s439_s10  ;;  %p443_p3 = scmp.lt.u32.totalorder %s439_s10, %s716_s0 }
  0x2a   :  { %p445_p4 = pnand %p443_p3, %p440_p2 }
  0x2c   :  { %448 = shalt.err (!%p445_p4)
}
  0x2d   :  { %s449_s3 = scalar_lea.vmem %s25_s28, 128  ;;  %p454_p6 = scmp.lt.s32.totalorder %s25_s28, %s25_s28 }
  0x2e   :  { %p450_p5 = scmp.ne.s32.totalorder %s25_s28, %s449_s3  ;;  %p455_p7 = scmp.lt.s32.totalorder %s449_s3, %s449_s3 }
  0x30   :  { %p456_p8 = por %p455_p7, %p454_p6 }
  0x32   :  { %p457_p9 = pnand %p456_p8, %p450_p5 }
  0x34   :  { %460 = shalt.err (!%p457_p9)
}
  0x35   :  { %27 = dma.hbm_to_vmem [thread:$0]  %s716_s0, 128, %s25_s28, [#allocation3]  }
  0x36   :  { %s461_s18 = scalar_lea.hbm %s718_s2, 128 }
  0x37   :  { %p462_p10 = scmp.ne.s32.totalorder %s718_s2, %s461_s18  ;;  %p465_p11 = scmp.lt.u32.totalorder %s461_s18, %s718_s2 }
  0x39   :  { %p467_p12 = pnand %p465_p11, %p462_p10 }
  0x3b   :  { %470 = shalt.err (!%p467_p12)
}
  0x3c   :  { %s471_s24 = scalar_lea.vmem %s45_s30, 128  ;;  %p476_p0 = scmp.lt.s32.totalorder %s45_s30, %s45_s30 }
  0x3d   :  { %p472_p13 = scmp.ne.s32.totalorder %s45_s30, %s471_s24  ;;  %p477_p1 = scmp.lt.s32.totalorder %s471_s24, %s471_s24 }
  0x3f   :  { %p478_p2 = por %p477_p1, %p476_p0 }
  0x41   :  { %p479_p3 = pnand %p478_p2, %p472_p13 }
  0x43   :  { %482 = shalt.err (!%p479_p3)
}
  0x44   :  { %47 = dma.hbm_to_vmem [thread:$0]  %s718_s2, 128, %s45_s30, [#allocation6]  }
  0x45   :  { %s565_s26 = smov [#allocation10]   ;;  %s483_s9 = scalar_lea.hbm %s720_s4, 512 }
  0x46   :  { %s65_s28 = sshll.u32 %s565_s26, 4  ;;  %p484_p4 = scmp.ne.s32.totalorder %s720_s4, %s483_s9  ;;  %s66_s28 = int_to_ptr.vmem [resolvable:$true] %s65_s28 }
  0x47   :  { %p487_p5 = scmp.lt.u32.totalorder %s483_s9, %s720_s4 }
  0x49   :  { %p489_p6 = pnand %p487_p5, %p484_p4 }
  0x4b   :  { %492 = shalt.err (!%p489_p6)
}
  0x4c   :  { %s493_s14 = scalar_lea.vmem %s66_s28, 512  ;;  %p498_p8 = scmp.lt.s32.totalorder %s66_s28, %s66_s28 }
  0x4d   :  { %p494_p7 = scmp.ne.s32.totalorder %s66_s28, %s493_s14  ;;  %p499_p9 = scmp.lt.s32.totalorder %s493_s14, %s493_s14 }
  0x4f   :  { %p500_p10 = por %p499_p9, %p498_p8 }
  0x51   :  { %p501_p11 = pnand %p500_p10, %p494_p7 }
  0x53   :  { %504 = shalt.err (!%p501_p11)
}
  0x54   :  { %71 = dma.hbm_to_vmem [thread:$0]  %s720_s4, 512, %s66_s28, [#allocation9], %s561_s1, %s561_s1, %s562_s23  }
  0x55   :  { %549 = dma.done.wait [#allocation3], 128  }
  0x56   :  { %550 = vsyncadd [#allocation3], 4294967168 }
  0x57   :  { %551 = dma.done.wait [#allocation6], 256  }
  0x58   :  { %552 = vsyncadd [#allocation6], 4294967040 }
  0x59   :  { %553 = dma.done.wait [#allocation9], 1280  }
  0x5a   :  { %554 = vsyncadd [#allocation9], 4294966016  ;;  %v566_v0 = vmov 0.0|0.0   ;;  %vm567_vm0 = vmmov 0   ;;  %v568_v1 = vmov 0.0   ;;  %v89_v2 = vld [vmem:[#allocation8] sm:$0xff] }
  0x5b   :  { %368 = vmatprep.subr.bf16.mxu1 %v566_v0  ;;  %362 = vmatprep.subr.bf16.mxu0 %v566_v0  ;;  %v90_v3 = vld [vmem:[#allocation8 + $0x8] sm:$0xff]  ;;  %v95_v4 = vld [vmem:[#allocation10] sm:$0xff]  ;;  %v96_v6 = vld [vmem:[#allocation10 + $0x8] sm:$0xff]  ;;  %vm101_vm1 = vcmask 261120   ;;  %vm175_vm2 = vcmask 392192   ;;  %s569_s23 = smov 96  }
  0x5c   :  { %344 = vmatprep.mubr.msk.f32.mxu0 %vm567_vm0, %v568_v1  ;;  %359 = vmatprep.mubr.msk.f32.mxu1 %vm567_vm0, %v568_v1  ;;  %v369_v5 = vpack.c.bf16 %v90_v3, %v89_v2  ;;  %v91_v7 = vld [vmem:[#allocation8 + $0x10] sm:$0xff]  ;;  %v92_v8 = vld [vmem:[#allocation8 + $0x18] sm:$0xff]  ;;  %v363_v9 = vpack.c.bf16 %v96_v6, %v95_v4  ;;  %v97_v10 = vld [vmem:[#allocation10 + $0x10] sm:$0xff]  ;;  %s570_s3 = smov 32   ;;  %s572_s15 = smov [#allocation12]  }
  0x5d   :  { %v98_v11 = vld [vmem:[#allocation10 + $0x18] sm:$0xff]  ;;  %v372_v12 = vpack.c.bf16 %v92_v8, %v91_v7  ;;  %v93_v14 = vld [vmem:[#allocation8 + $0x20] sm:$0xff]  ;;  %v100_v17 = vld [vmem:[#allocation5] sm:$0xff]  ;;  %s304_s16 = sshll.u32 %s572_s15, 4  ;;  %s305_s16 = int_to_ptr.vmem [resolvable:$true] %s304_s16 }
  0x5e   :  { %370 = vmatpush3.bf16.msra.mxu1 %v369_v5  ;;  %364 = vmatpush3.bf16.msra.mxu0 %v363_v9  ;;  %v366_v13 = vpack.c.bf16 %v98_v11, %v97_v10  ;;  %v94_v15 = vld [vmem:[#allocation8 + $0x28] sm:$0xff]  ;;  %v263_v29 = vld [vmem:[#allocation7] sm:$0xff] }
  0x5f   :  { %371 = vmatprep.subr.bf16.mxu1 %v566_v0  ;;  %365 = vmatprep.subr.bf16.mxu0 %v566_v0  ;;  %v375_v16 = vpack.c.bf16 %v94_v15, %v93_v14  ;;  %v99_v18 = vld [vmem:[#allocation2] sm:$0xff] }
  0x60   :  { %v321_v22 = vld [vmem:[%s721_s5] ss:$0 sm:$0xff]  ;;  %s571_s5 = smov [#allocation11]  }
  0x61   :  { %s294_s27 = sshll.u32 %s571_s5, 4  ;;  %s295_s27 = int_to_ptr.vmem [resolvable:$true] %s294_s27 }
  0x62   :  { %373 = vmatpush3.bf16.msra.mxu1 %v372_v12  ;;  %367 = vmatpush3.bf16.msra.mxu0 %v366_v13  ;;  %s505_s17 = scalar_lea.vmem %s295_s27, 128  ;;  %p510_p13 = scmp.lt.s32.totalorder %s295_s27, %s295_s27 }
  0x63   :  { %374 = vmatprep.subr.bf16.mxu1 %v566_v0  ;;  %p506_p12 = scmp.ne.s32.totalorder %s295_s27, %s505_s17  ;;  %p511_p0 = scmp.lt.s32.totalorder %s505_s17, %s505_s17 }
  0x65   :  { %345 = vmatmul.mubr.msk.f32.vlgmr.msra.gmra.mrb[0].mxu0 %vm101_vm1, %v100_v17  ;;  %p512_p1 = por %p511_p0, %p510_p13 }
  0x66   :  { %376 = vmatpush3.bf16.msra.mxu1 %v375_v16 }
  0x67   :  { %p513_p2 = pnand %p512_p1, %p506_p12 }
  0x69   :  { %360 = vmatmul.mubr.msk.f32.vlgmr.msra.gmra.mrb[0].mxu1 %vm175_vm2, %v99_v18 }
 0x138   :  { %v171_v19 = vpop.f32.mrb[0].mxu0 }
 0x139   :  { %v346_v20 = vpop.f32.mrb[1].mxu0 }
 0x13c   :  { %v245_v21 = vpop.f32.mrb[0].mxu1 }
 0x13d   :  { %v246_v23 = vadd.f32 %v245_v21, %v171_v19  ;;  %v361_v24 = vpop.f32.mrb[1].mxu1 }
 0x13f   :  { %v256_v25 = vadd.f32 %v321_v22, %v246_v23 }
 0x141   :  { %265 = vrot.lane.b32.xlu0 %v256_v25, %s569_s23  ;;  %v322_v26 = vmul.f32 -1.442695, %v256_v25 }
 0x143   :  { %391 = vpow2.f32 %v322_v26 }
 0x14d   :  { %v392_v27 = vpop.eup %391 }
 0x14e   :  { %v260_v28 = vadd.f32 1.0, %v392_v27 }
 0x150   :  { %393 = vrcp.f32 %v260_v28 }
 0x15a   :  { %v394_v32 = vpop.eup %393 }
 0x1b3   :  { %v266_v30 = vpop.permute.xlu0 %265 }
 0x1b4   :  { %v268_v31 = vsub.f32 %v263_v29, %v266_v30 }
 0x1b6   :  { %v269_v33 = vmul.f32 %v394_v32, %v268_v31 }
 0x1b8   :  { %271 = vrot.lane.b32.xlu0 %v269_v33, %s570_s3 }
 0x22a   :  { %v272_v34 = vpop.permute.xlu0 %271 }
 0x22b   :  { %v274_v35 = vadd.f32 %v272_v34, %v256_v25 }
 0x22d   :  { %vm275_vm3 = vcmp.ge.f32.partialorder %v274_v35, 0.0 }
 0x22e   :  { %v323_v36 = vsel %vm275_vm3, 1.0, %v568_v1 }
 0x22f   :  { %279 = vrot.lane.b32.xlu1 %v323_v36, %s569_s23 }
 0x233   :  { %284 = vrot.lane.b32.xlu1 %v274_v35, %s569_s23 }
 0x2a1   :  { %v280_v37 = vpop.permute.xlu1 %279 }
 0x2a2   :  { %282 = vst.msk [vmem:[#allocation11] sm:$0xff] %vm101_vm1, %v280_v37 }
 0x2a3   :  { %516 = shalt.err (!%p513_p2)
}
 0x2a4   :  { %s517_s20 = scalar_lea.hbm %s722_s6, 128 }
 0x2a5   :  { %p518_p3 = scmp.ne.s32.totalorder %s722_s6, %s517_s20  ;;  %p521_p4 = scmp.lt.u32.totalorder %s517_s20, %s722_s6 }
 0x2a7   :  { %p523_p5 = pnand %p521_p4, %p518_p3 }
 0x2a9   :  { %526 = shalt.err (!%p523_p5)
}
 0x2aa   :  { %297 = dma.vmem_to_hbm [thread:$0]  %s295_s27, 128, %s722_s6, [#allocation4]   ;;  %v285_v38 = vpop.permute.xlu1 %284 }
 0x2ab   :  { %287 = vst.msk [vmem:[#allocation12] sm:$0xff] %vm101_vm1, %v285_v38  ;;  %s527_s28 = scalar_lea.vmem %s305_s16, 128  ;;  %p532_p7 = scmp.lt.s32.totalorder %s305_s16, %s305_s16 }
 0x2ac   :  { %p528_p6 = scmp.ne.s32.totalorder %s305_s16, %s527_s28  ;;  %p533_p8 = scmp.lt.s32.totalorder %s527_s28, %s527_s28 }
 0x2ae   :  { %p534_p9 = por %p533_p8, %p532_p7 }
 0x2b0   :  { %p535_p10 = pnand %p534_p9, %p528_p6 }
 0x2b2   :  { %538 = shalt.err (!%p535_p10)
}
 0x2b3   :  { %s539_s9 = scalar_lea.hbm %s723_s7, 128 }
 0x2b4   :  { %p540_p11 = scmp.ne.s32.totalorder %s723_s7, %s539_s9  ;;  %p543_p12 = scmp.lt.u32.totalorder %s539_s9, %s723_s7 }
 0x2b6   :  { %p545_p13 = pnand %p543_p12, %p540_p11 }
 0x2b8   :  { %548 = shalt.err (!%p545_p13)
}
 0x2b9   :  { %307 = dma.vmem_to_hbm [thread:$0]  %s305_s16, 128, %s723_s7, [#allocation13]  }
 0x2ba   :  { %555 = dma.done.wait [#allocation4], 128  }
 0x2bb   :  { %556 = vsyncadd [#allocation4], 4294967168 }
 0x2bc   :  { %557 = dma.done.wait [#allocation13], 128  }
 0x2bd   :  { %558 = vsyncadd [#allocation13], 4294967168 }
 0x2be   :  { %314 = vsyncpa [#allocation3], 1 }
 0x2bf   :  { %315 = vsyncpa [#allocation6], 1 }
 0x2c0   :  { %316 = vsyncpa [#allocation9], 1 }
 0x2c1   :  { %317 = vsyncpa [#allocation4], 1 }
 0x2c2   :  { %318 = vsyncpa [#allocation13], 1 }

</bundles_post_ra>
